<compile_context>
chip_gen: v6e
topology: v6e:2x2x1
jax: 0.10.0
libtpu: 0.0.40
codegen_flags: <defaults>
</compile_context>

<pallas_src>
import functools

import jax
import jax.numpy as jnp
from jax import lax
from jax.experimental import pallas as pl
from jax.experimental.pallas import tpu as pltpu

_VMEM_LIMIT_BYTES = 48 * 1024 * 1024  # below physical VMEM on v5e/v6e (128 MiB) and v7x (64 MiB)


def _seq_tile(n, cap):
    """Largest tile <= cap that divides n and is a multiple of 8, else the full n."""
    if n <= cap:
        return n
    for t in range(cap, 7, -1):
        if n % t == 0 and t % 8 == 0:
            return t
    return n


# ---------------------------------------------------------------------------
# Kernel 1: fused QKV projection.
#   - native-dtype operands straight into the MXU, f32 accumulation
#   - softmax scale folded into q here
#   - lane-dense (tile, C) output stores, batch dim squeezed from the block
# ---------------------------------------------------------------------------
def _qkv_proj_kernel(x_ref, wqkv_ref, q_ref, k_ref, v_ref, *, scale):
    x = x_ref[...]                                        # (tn, C), native dtype
    qkv = jnp.dot(x, wqkv_ref[...],                       # native in, f32 accumulate
                  preferred_element_type=jnp.float32)     # (tn, 3C) f32
    C = x.shape[-1]
    q_ref[...] = (qkv[:, :C] * scale).astype(q_ref.dtype)
    k_ref[...] = qkv[:, C:2 * C].astype(k_ref.dtype)
    v_ref[...] = qkv[:, 2 * C:].astype(v_ref.dtype)


# ---------------------------------------------------------------------------
# Kernel 2: flash-style attention (online softmax over KV tiles) with the output
# projection fused into the final KV step.
#   - heads batched into 3-D dot_generals (no per-head loop / k^T / concat)
#   - grid = (B, q tiles, kv tiles): ("parallel", "parallel", "arbitrary")
#   - EUP reciprocal for the softmax denominator
# ---------------------------------------------------------------------------
def _flash_attn_proj_kernel(q_ref, k_ref, v_ref, wproj_ref, bproj_ref, o_ref,
                            m_sc, l_sc, acc_sc):
    ki = pl.program_id(2)

    @pl.when(ki == 0)
    def _():
        m_sc[...] = jnp.full(m_sc.shape, -jnp.inf, dtype=m_sc.dtype)
        l_sc[...] = jnp.zeros(l_sc.shape, l_sc.dtype)
        acc_sc[...] = jnp.zeros(acc_sc.shape, acc_sc.dtype)

    q = q_ref[...]                                        # (H, tq, hd) — scale pre-folded
    k = k_ref[...]                                        # (H, tk, hd)
    v = v_ref[...]                                        # (H, tk, hd)

    # Scores: contract head_dim directly (no materialized k^T), batch over heads.
    s = lax.dot_general(q, k,
                        dimension_numbers=(((2,), (2,)), ((0,), (0,))),
                        preferred_element_type=jnp.float32)       # (H, tq, tk) f32

    m_prev = m_sc[...]
    m_new = jnp.maximum(m_prev, jnp.max(s, axis=-1, keepdims=True))
    alpha = jnp.exp(m_prev - m_new)
    p = jnp.exp(s - m_new)
    l_sc[...] = alpha * l_sc[...] + jnp.sum(p, axis=-1, keepdims=True)
    pv = lax.dot_general(p.astype(v.dtype), v,
                         dimension_numbers=(((2,), (1,)), ((0,), (0,))),
                         preferred_element_type=jnp.float32)      # (H, tq, hd) f32
    acc_sc[...] = alpha * acc_sc[...] + pv
    m_sc[...] = m_new

    @pl.when(ki == pl.num_programs(2) - 1)
    def _():
        # Normalize with the EUP reciprocal, then apply the output projection per
        # head and reduce over heads:  y @ Wp^T == sum_h y_h @ Wp^T[h*hd:(h+1)*hd, :].
        y = acc_sc[...] * pl.reciprocal(l_sc[...], approx=True)   # (H, tq, hd) f32
        z = lax.dot_general(y.astype(wproj_ref.dtype), wproj_ref[...],
                            dimension_numbers=(((2,), (1,)), ((0,), (0,))),
                            preferred_element_type=jnp.float32)   # (H, tq, C) f32
        out = jnp.sum(z, axis=0) + bproj_ref[...].astype(jnp.float32)  # (tq, C)
        o_ref[...] = out.astype(o_ref.dtype)


def self_attention(x, wqkv_t, wproj_t, bproj, num_heads):
    """x: (B, N, C); wqkv_t: (C, 3C); wproj_t: (C, C); bproj: (1, C)."""
    B, N, C = x.shape
    assert C % num_heads == 0
    H = num_heads
    hd = C // H
    scale = hd ** (-0.5)

    tn = _seq_tile(N, 256)   # projection sequence tile
    tq = _seq_tile(N, 128)   # query tile (sized for v7x's 64 MiB VMEM)
    tk = _seq_tile(N, 256)   # kv tile

    # ---- 1) QKV projection (q pre-scaled), lane-dense (B, N, C) outputs ----
    q, k, v = pl.pallas_call(
        functools.partial(_qkv_proj_kernel, scale=scale),
        out_shape=[jax.ShapeDtypeStruct((B, N, C), x.dtype)] * 3,
        grid=(B, N // tn),
        in_specs=[
            pl.BlockSpec((None, tn, C), lambda b, i: (b, i, 0)),
            pl.BlockSpec((C, 3 * C), lambda b, i: (0, 0)),       # resident weight
        ],
        out_specs=[pl.BlockSpec((None, tn, C), lambda b, i: (b, i, 0))] * 3,
        compiler_params=pltpu.CompilerParams(
            dimension_semantics=("parallel", "parallel"),
            vmem_limit_bytes=_VMEM_LIMIT_BYTES),
    )(x, wqkv_t)

    # ---- 2) head-major layout (B, H, N, hd): the same permute the module does ----
    def to_heads(t):
        return t.reshape(B, N, H, hd).transpose(0, 2, 1, 3)

    qh, kh, vh = to_heads(q), to_heads(k), to_heads(v)
    wproj_r = wproj_t.reshape(H, hd, C)          # contiguous row split: free reshape

    # ---- 3) flash attention over KV tiles + fused output projection ----
    out = pl.pallas_call(
        _flash_attn_proj_kernel,
        out_shape=jax.ShapeDtypeStruct((B, N, C), x.dtype),
        grid=(B, N // tq, N // tk),
        in_specs=[
            pl.BlockSpec((None, H, tq, hd), lambda b, qi, ki: (b, 0, qi, 0)),
            pl.BlockSpec((None, H, tk, hd), lambda b, qi, ki: (b, 0, ki, 0)),
            pl.BlockSpec((None, H, tk, hd), lambda b, qi, ki: (b, 0, ki, 0)),
            pl.BlockSpec((H, hd, C), lambda b, qi, ki: (0, 0, 0)),   # resident
            pl.BlockSpec((1, C), lambda b, qi, ki: (0, 0)),          # resident
        ],
        out_specs=pl.BlockSpec((None, tq, C), lambda b, qi, ki: (b, qi, 0)),
        scratch_shapes=[
            pltpu.VMEM((H, tq, 1), jnp.float32),    # running row max
            pltpu.VMEM((H, tq, 1), jnp.float32),    # running denominator
            pltpu.VMEM((H, tq, hd), jnp.float32),   # running numerator
        ],
        compiler_params=pltpu.CompilerParams(
            dimension_semantics=("parallel", "parallel", "arbitrary"),
            vmem_limit_bytes=_VMEM_LIMIT_BYTES),
    )(qh, kh, vh, wproj_r, bproj)
    return out


def self_attention_ref(x, wqkv_t, wproj_t, bproj, num_heads):
    """Pure-JAX reference mirroring the PyTorch forward."""
    B, N, C = x.shape
    hd = C // num_heads
    scale = hd ** (-0.5)
    qkv = x @ wqkv_t                                       # (B, N, 3C)
    qkv = qkv.reshape(B, N, 3, num_heads, hd)
    qkv = jnp.transpose(qkv, (2, 0, 3, 1, 4))              # (3, B, H, N, hd)
    q, k, v = qkv[0], qkv[1], qkv[2]
    attn = jnp.einsum("bhqd,bhkd->bhqk", q, k) * scale
    attn = jax.nn.softmax(attn, axis=-1)
    y = jnp.einsum("bhqk,bhkd->bhqd", attn, v)             # (B, H, N, hd)
    y = jnp.transpose(y, (0, 2, 1, 3)).reshape(B, N, C)
    return y @ wproj_t + bproj[0]


if __name__ == "__main__":
    B, N, C = 2, 16, 32
    num_heads = 8

    key = jax.random.PRNGKey(0)
    kx, kw1, kw2, kb = jax.random.split(key, 4)

    x = jax.random.normal(kx, (B, N, C), dtype=jnp.float32)

    # PyTorch param shapes: qkv.weight (3C, C) [qkv_bias=False], proj.weight (C, C),
    # proj.bias (C,). We pass them pre-transposed for `x @ W^T`.
    wqkv = jax.random.normal(kw1, (3 * C, C), dtype=jnp.float32) * 0.2
    wproj = jax.random.normal(kw2, (C, C), dtype=jnp.float32) * 0.2
    bproj = jax.random.normal(kb, (C,), dtype=jnp.float32) * 0.2

    wqkv_t = wqkv.T                     # (C, 3C)
    wproj_t = wproj.T                   # (C, C)
    bproj2d = bproj.reshape(1, C)       # (1, C)

    out = self_attention(x, wqkv_t, wproj_t, bproj2d, num_heads)
    out = jax.block_until_ready(out)

    ref = self_attention_ref(x, wqkv_t, wproj_t, bproj2d, num_heads)
    assert out.shape == (B, N, C)
    assert jnp.allclose(out, ref, atol=1e-2, rtol=1e-2), (
        "mismatch vs reference: max abs diff = "
        + str(float(jnp.max(jnp.abs(out - ref)))))

    print("KERNEL_OK")
</pallas_src>

<mosaic_0001>
module attributes {stable_mosaic.version = 11 : i64} {
  func.func @_qkv_proj_kernel(%arg0: i32, %arg1: i32, %arg2: memref<1x16x32xf32, #tpu.memory_space<vmem>>, %arg3: memref<32x96xf32, #tpu.memory_space<vmem>>, %arg4: memref<1x16x32xf32, #tpu.memory_space<vmem>>, %arg5: memref<1x16x32xf32, #tpu.memory_space<vmem>>, %arg6: memref<1x16x32xf32, #tpu.memory_space<vmem>>) attributes {dimension_semantics = [#tpu.dimension_semantics<parallel>, #tpu.dimension_semantics<parallel>], iteration_bounds = array<i64: 2, 1>, scalar_prefetch = 0 : i64, scratch_operands = 0 : i64, tpu.core_type = #tpu.core_type<tc>, window_params = [{transform_indices = @transform_0, window_bounds = array<i64: 1, 16, 32>}, {pipeline_mode = #tpu.pipeline_mode<synchronous>, transform_indices = @transform_1, window_bounds = array<i64: 32, 96>}, {transform_indices = @transform_2, window_bounds = array<i64: 1, 16, 32>}, {transform_indices = @transform_3, window_bounds = array<i64: 1, 16, 32>}, {transform_indices = @transform_4, window_bounds = array<i64: 1, 16, 32>}]} {
    %c0 = arith.constant 0 : index
    %c0_0 = arith.constant 0 : index
    %c0_1 = arith.constant 0 : index
    %0 = vector.load %arg2[%c0, %c0_0, %c0_1] : memref<1x16x32xf32, #tpu.memory_space<vmem>>, vector<1x16x32xf32>
    %1 = vector.shape_cast %0 : vector<1x16x32xf32> to vector<16x32xf32>
    %c0_2 = arith.constant 0 : index
    %c0_3 = arith.constant 0 : index
    %2 = vector.load %arg3[%c0_2, %c0_3] : memref<32x96xf32, #tpu.memory_space<vmem>>, vector<32x96xf32>
    %cst = arith.constant dense<0.000000e+00> : vector<16x96xf32>
    %3 = tpu.matmul %1, %2, %cst {dimension_numbers = #tpu.dot_dimension_numbers<[1], [0], [0], [1], [0, 0, 1, 1], [], []>} : vector<16x32xf32>, vector<32x96xf32>, vector<16x96xf32> -> vector<16x96xf32>
    %4 = vector.extract_strided_slice %3 {offsets = [0, 0], sizes = [16, 32], strides = [1, 1]} : vector<16x96xf32> to vector<16x32xf32>
    %cst_4 = arith.constant 5.000000e-01 : f32
    %5 = vector.broadcast %cst_4 : f32 to vector<16x32xf32>
    %6 = arith.mulf %4, %5 : vector<16x32xf32>
    %c0_5 = arith.constant 0 : index
    %c0_6 = arith.constant 0 : index
    %c0_7 = arith.constant 0 : index
    %7 = vector.load %arg4[%c0_5, %c0_6, %c0_7] : memref<1x16x32xf32, #tpu.memory_space<vmem>>, vector<1x16x32xf32>
    %8 = vector.shape_cast %7 : vector<1x16x32xf32> to vector<16x32xf32>
    %9 = vector.shape_cast %6 : vector<16x32xf32> to vector<1x16x32xf32>
    tpu.vector_store %arg4[%c0_5, %c0_6, %c0_7], %9 {strides = array<i32>} : memref<1x16x32xf32, #tpu.memory_space<vmem>>, vector<1x16x32xf32>,
    %10 = vector.extract_strided_slice %3 {offsets = [0, 32], sizes = [16, 32], strides = [1, 1]} : vector<16x96xf32> to vector<16x32xf32>
    %c0_8 = arith.constant 0 : index
    %c0_9 = arith.constant 0 : index
    %c0_10 = arith.constant 0 : index
    %11 = vector.load %arg5[%c0_8, %c0_9, %c0_10] : memref<1x16x32xf32, #tpu.memory_space<vmem>>, vector<1x16x32xf32>
    %12 = vector.shape_cast %11 : vector<1x16x32xf32> to vector<16x32xf32>
    %13 = vector.shape_cast %10 : vector<16x32xf32> to vector<1x16x32xf32>
    tpu.vector_store %arg5[%c0_8, %c0_9, %c0_10], %13 {strides = array<i32>} : memref<1x16x32xf32, #tpu.memory_space<vmem>>, vector<1x16x32xf32>,
    %14 = vector.extract_strided_slice %3 {offsets = [0, 64], sizes = [16, 32], strides = [1, 1]} : vector<16x96xf32> to vector<16x32xf32>
    %c0_11 = arith.constant 0 : index
    %c0_12 = arith.constant 0 : index
    %c0_13 = arith.constant 0 : index
    %15 = vector.load %arg6[%c0_11, %c0_12, %c0_13] : memref<1x16x32xf32, #tpu.memory_space<vmem>>, vector<1x16x32xf32>
    %16 = vector.shape_cast %15 : vector<1x16x32xf32> to vector<16x32xf32>
    %17 = vector.shape_cast %14 : vector<16x32xf32> to vector<1x16x32xf32>
    tpu.vector_store %arg6[%c0_11, %c0_12, %c0_13], %17 {strides = array<i32>} : memref<1x16x32xf32, #tpu.memory_space<vmem>>, vector<1x16x32xf32>,
    return
  }
  func.func @transform_0(%arg0: i32, %arg1: i32) -> (i32, i32, i32) {
    %c0_i32 = arith.constant 0 : i32
    %c0_i32_0 = arith.constant 0 : i32
    return %arg0, %arg1, %c0_i32 : i32, i32, i32
  }
  func.func @transform_1(%arg0: i32, %arg1: i32) -> (i32, i32) {
    %c0_i32 = arith.constant 0 : i32
    %c0_i32_0 = arith.constant 0 : i32
    %c0_i32_1 = arith.constant 0 : i32
    return %c0_i32, %c0_i32_0 : i32, i32
  }
  func.func @transform_2(%arg0: i32, %arg1: i32) -> (i32, i32, i32) {
    %c0_i32 = arith.constant 0 : i32
    %c0_i32_0 = arith.constant 0 : i32
    return %arg0, %arg1, %c0_i32 : i32, i32, i32
  }
  func.func @transform_3(%arg0: i32, %arg1: i32) -> (i32, i32, i32) {
    %c0_i32 = arith.constant 0 : i32
    %c0_i32_0 = arith.constant 0 : i32
    return %arg0, %arg1, %c0_i32 : i32, i32, i32
  }
  func.func @transform_4(%arg0: i32, %arg1: i32) -> (i32, i32, i32) {
    %c0_i32 = arith.constant 0 : i32
    %c0_i32_0 = arith.constant 0 : i32
    return %arg0, %arg1, %c0_i32 : i32, i32, i32
  }
}

</mosaic_0001>

<bundles_post_ra>
// kernel: tpu_custom_call.1
= control target key start
LH: loop header
LB: loop body
LE: loop exit
PB: predicated region body
PF: predicated region fallthrough
CT: control target
= control target key end

     0   :  { %s1258_s0 = inlined_call_operand.hbm [shape: f32[2,16,32], index: 0, kind: input, shape index: {}]   ;;  %s1259_s1 = inlined_call_operand.hbm [shape: f32[32,96], index: 1, kind: input, shape index: {}]   ;;  %s1260_s2 = inlined_call_operand.hbm [shape: f32[2,16,32], index: 2, kind: output, shape index: {0}]   ;;  %s1261_s3 = inlined_call_operand.hbm [shape: f32[2,16,32], index: 3, kind: output, shape index: {1}]   ;;  %s1262_s4 = inlined_call_operand.hbm [shape: f32[2,16,32], index: 4, kind: output, shape index: {2}]  }
   0x1   :  { %1267 = sst [smem:[#allocation15_spill]] %s1259_s1 }
   0x2   :  { %10 = vsyncpa [#allocation3], 0 }
   0x3   :  { %12 = vsyncpa [#allocation3 + $0x1], 0 }
   0x4   :  { %13 = vsyncpa [#allocation6], 0 }
   0x5   :  { %14 = vsyncpa [#allocation4], 0 }
   0x6   :  { %16 = vsyncpa [#allocation4 + $0x1], 0 }
   0x7   :  { %17 = vsyncpa [#allocation9], 0 }
   0x8   :  { %19 = vsyncpa [#allocation9 + $0x1], 0  ;;  %s980_s15 = smov 0   ;;  %s982_s16 = smov 0  }
   0x9   :  { %s984_s17 = smov 0   ;;  %s986_s18 = smov 0  }
   0xa   :  { %s988_s19 = smov 0   ;;  %s990_s20 = smov 0  }
   0xb LB: > { %s1011_s21 = sadd.s32 4294967295, %s942_s20   ;;  %s1263_s22 = sadd.s32 4294967294, %s942_s20   ;;  %s942_s20 = sphi %s990_s20, %s25_s20   ;;  %s938_s19 = sphi %s988_s19, %s1288_s19   ;;  %s934_s18 = sphi %s986_s18, %s1287_s18   ;;  %s930_s17 = sphi %s984_s17, %s1286_s17   ;;  %s926_s16 = sphi %s982_s16, %s1285_s16   ;;  %s922_s15 = sphi %s980_s15, %s1284_s15  }
   0xc   : > { %p59_p0 = scmp.ne.s32.totalorder %s926_s16, %s922_s15  ;;  %p1266_p1 = scmp.eq.s32.totalorder %s1011_s21, 0 }
   0xd   : > { %p112_p3 = scmp.eq.s32.totalorder %s1263_s22, 1  ;;  %p613_p5 = scmp.ge.s32.totalorder %s942_s20, 1 }
   0xe   : > { %p1022_p4 = por %p1266_p1, %p59_p0  ;;  %p175_p7 = scmp.lt.s32.totalorder %s942_s20, 3 }
   0xf   : > { %p1027_p6 = por %p112_p3, %p59_p0  ;;  %s944_s26 = smov [#allocation5]  }
  0x10   : > { %p1032_p8 = pnand %p613_p5, %p175_p7  ;;  %s187_s27 = sshll.u32 %s944_s26, 4  ;;  %s188_s27 = int_to_ptr.vmem [resolvable:$true] %s187_s27 }
  0x11   : > { %s1269_s24 = scalar_select %p1027_p6, 1, 0 }
  0x12   : > { %p671_p9 = pneg %p1032_p8  ;;  %s37_s29 = sadd.s32 1, %s938_s19 }
  0x13   : > { %s759_s30 = scalar_lea.vmem %s188_s27, 512  ;;  %p767_p5 = scmp.lt.s32.totalorder %s188_s27, %s188_s27 }
  0x14   : > { %p1041_p11 = pnand %p671_p9, %p1266_p1  ;;  %p760_p13 = scmp.ne.s32.totalorder %s188_s27, %s759_s30 }
  0x15   : > { %p768_p7 = scmp.lt.s32.totalorder %s759_s30, %s759_s30 }
  0x16   : > { %p750_p12 = pneg %p1041_p11 }
  0x17   : > { %p769_p2 = por %p768_p7, %p767_p5 }
  0x18   : > { %p762_p0 = pnand %p760_p13, %p750_p12 }
  0x1a   : > { %p763_p3 = pneg %p762_p0 }
  0x1c   : > { %p770_p6 = pnand %p769_p2, %p763_p3 }
  0x1e   : > { %773 = shalt.err (!%p770_p6)
}
  0x1f   : > { %s1264_s5 = smov 128   ;;  %s1265_s6 = smov 8  }
  0x20   : > { %s1272_s1 = sld [smem:[#allocation15_spill]]  ;;  %p39_p2 = scmp.ge.s32.totalorder %s37_s29, 2 }
  0x21   : > { %s46_s9 = sadd.s32 1, %s930_s17  ;;  %p53_p6 = scmp.ne.s32.totalorder %s930_s17, %s926_s16 }
  0x22   : > { %p54_p9 = scmp.eq.s32.totalorder %s942_s20, 0  ;;  %s1290_s29 = smov (%p39_p2, %s37_s29), 0 }
  0x23   : > { %p1274_p13 = scmp.eq.s32.totalorder %s1011_s21, 1  ;;  %s41_s12 = ssub.s32 %s938_s19, %s1290_s29 }
  0x24   : > { %p1062_p12 = por %p54_p9, %p53_p6  ;;  %p690_p3 = scmp.lt.s32.totalorder %s942_s20, 2 }
  0x25   : > { %p1068_p0 = por %p1274_p13, %p53_p6  ;;  %s201_s13 = sand.u32 1, %s930_s17  }
  0x26   : > { %674 = dma.hbm_to_vmem [thread:$0]  (!%p1041_p11), %s1272_s1, 512, %s188_s27, [#allocation6], %s1264_s5, %s1264_s5, %s1265_s6  }
  0x27   : > { %p44_p11 = scmp.eq.s32.totalorder %s41_s12, 0  ;;  %s616_s14 = sshll.u32 %s201_s13, 4 }
  0x28   : > { %s638_s27 = sshll.u32 %s938_s19, 8  ;;  %s205_s8 = scalar_lea.vmem [#allocation2], %s616_s14 }
  0x29   : > { %s1077_s26 = scalar_select %p44_p11, %s930_s17, %s46_s9  }
  0x2a   : > { %s213_s7 = scalar_lea.hbm %s1258_s0, %s638_s27  ;;  %s214_s22 = sshll.u32 %s205_s8, 4  ;;  %s215_s22 = int_to_ptr.vmem [resolvable:$true] %s214_s22 }
  0x2b   : > { %p1085_p5 = pnand %p690_p3, %p1062_p12  ;;  %s202_s6 = scalar_lea.sflag [#allocation3], %s201_s13 }
  0x2c   : > { %s787_s12 = scalar_lea.vmem %s215_s22, 256  ;;  %s947_s9 = smov [#allocation2]  }
  0x2d   : > { %p776_p7 = pneg %p1085_p5  ;;  %p788_p2 = scmp.ne.s32.totalorder %s215_s22, %s787_s12 }
  0x2e   : > { %s792_s1 = sshll.u32 %s947_s9, 4  ;;  %s793_s1 = int_to_ptr.vmem [resolvable:$false] %s792_s1 }
  0x2f   : > { %p790_p6 = pnand %p788_p2, %p776_p7  ;;  %s794_s27 = scalar_lea.vmem %s793_s1, 512 }
  0x30   : > { %p795_p13 = scmp.lt.s32.totalorder %s215_s22, %s793_s1  ;;  %p796_p11 = scmp.lt.s32.totalorder %s794_s27, %s787_s12 }
  0x31   : > { %p791_p9 = pneg %p790_p6 }
  0x32   : > { %p797_p10 = por %p796_p11, %p795_p13 }
  0x34   : > { %p798_p1 = pnand %p797_p10, %p791_p9 }
  0x36   : > { %801 = shalt.err (!%p798_p1)
}
  0x37   : > { %s1277_s10 = smov 8   ;;  %s1278_s14 = smov 128  }
  0x38   : > { %678 = dma.hbm_to_vmem [thread:$0]  (!%p1085_p5), %s213_s7, 256, %s215_s22, %s202_s6, %s1278_s14, %s1278_s14, %s1277_s10  }
  0x39   : > { %226 = sbr.rel (%p1032_p8) target bundleno = 433 (0x1b1), region = 28  ;;  %s1099_s13 = sand.u32 (!%p1032_p8), 1, %s926_s16  }
  0x3a   : > { %s1102_s1 = sshll.u32 (!%p1032_p8), %s1099_s13, 4  ;;  %s229_s28 = scalar_lea.sflag (!%p1032_p8), [#allocation3], %s1099_s13 }
  0x3b   : > { %s232_s30 = scalar_lea.vmem (!%p1032_p8), [#allocation2], %s1102_s1 }
  0x3e   : > { %905 = dma.done.wait (%p1022_p4), %s229_s28, 256  }
  0x3f   : > { %907 = vsyncadd (%p1022_p4), %s229_s28, 4294967040  ;;  %p1279_p1 = scmp.eq.s32.totalorder %s1011_s21, 0 }
  0x41   : > { %909 = dma.done.wait (%p1279_p1), [#allocation6], 512   ;;  %p1280_p8 = pmov %p1279_p1 }
  0x42   : > { %vm281_vm0 = vcmask 261120   ;;  %v280_v0 = vld [vmem:[#allocation5 + $0x18] sm:$0xff]  ;;  %v279_v1 = vld [vmem:[#allocation5 + $0x10] sm:$0xff]  ;;  %v278_v3 = vld [vmem:[#allocation5 + $0x8] sm:$0xff]  ;;  %s1117_s22 = sshll.u32 %s934_s18, 8  ;;  %s256_s23 = scalar_lea.vmem [#allocation7], %s1102_s1 }
  0x43   : > { %911 = vsyncadd (%p1280_p8), [#allocation6], 4294966784  ;;  %648 = vmatprep.subr.mxu0 %v280_v0  ;;  %v275_v2 = vld [vmem:[%s232_s30] sm:$0xff]  ;;  %v276_v5 = vld [vmem:[%s232_s30 + $0x8] sm:$0xff]  ;;  %s411_s25 = sshll.u32 %s256_s23, 4  ;;  %s948_s5 = smov 64   ;;  %s1129_s25 = int_to_ptr.vmem [resolvable:$true] %s411_s25 }
  0x44   : > { %649 = vmatpush3.msra.mxu0 %v280_v0  ;;  %656 = vmatprep.mubr.msk.f32.mxu0 %vm281_vm0, %v275_v2  ;;  %v277_v4 = vld [vmem:[#allocation5] sm:$0xff]  ;;  %s949_s6 = smov 96   ;;  %s1127_s18 = scalar_lea.hbm %s1260_s2, %s1117_s22 }
  0x45   : > { %650 = vmatprep.subr.mxu0 %v279_v1  ;;  %s386_s12 = scalar_lea.sflag [#allocation4], %s1099_s13  ;;  %s802_s9 = scalar_lea.vmem %s1129_s25, 256 }
  0x46   : > { %651 = vmatpush3.msra.mxu0 %v279_v1  ;;  %p803_p4 = scmp.ne.s32.totalorder %s1129_s25, %s802_s9  ;;  %s950_s27 = smov [#allocation7]  }
  0x47   : > { %652 = vmatprep.subr.mxu0 %v278_v3  ;;  %s806_s10 = sshll.u32 %s950_s27, 4  ;;  %s807_s10 = int_to_ptr.vmem [resolvable:$false] %s806_s10 }
  0x48   : > { %653 = vmatpush3.msra.mxu0 %v278_v3  ;;  %p804_p10 = pnand %p803_p4, %p1068_p0  ;;  %s808_s14 = scalar_lea.vmem %s807_s10, 512 }
  0x49   : > { %654 = vmatprep.subr.mxu0 %v277_v4  ;;  %p809_p3 = scmp.lt.s32.totalorder %s1129_s25, %s807_s10  ;;  %p810_p5 = scmp.lt.s32.totalorder %s808_s14, %s802_s9 }
  0x4a   : > { %655 = vmatpush3.msra.mxu0 %v277_v4  ;;  %p805_p12 = pneg %p804_p10 }
  0x4b   : > { %657 = vmatmul.mubr.msk.f32.vlgmr.msra.gmra.mxu0 %vm281_vm0, %v276_v5  ;;  %p811_p7 = por %p810_p5, %p809_p3 }
  0x4d   : > { %p812_p2 = pnand %p811_p7, %p805_p12 }
 0x10b   : > { %v658_v6 = vpop.f32.mrf.mxu0 }
 0x10c   : > { %v364_v7 = vmul.f32 0.5, %v658_v6 }
 0x10d   : > { %v354_v8 = vpop.f32.mrf.mxu0 }
 0x10e   : > { %366 = vst.msk [vmem:[%s256_s23 + $0x8] sm:$0xff] %vm281_vm0, %v364_v7  ;;  %v363_v9 = vmul.f32 0.5, %v354_v8  ;;  %377 = vrot.lane.b32.xlu1 %v354_v8, %s948_s5  ;;  %369 = vrot.lane.b32.xlu0 %v354_v8, %s949_s6 }
 0x110   : > { %365 = vst.msk [vmem:[%s256_s23] sm:$0xff] %vm281_vm0, %v363_v9 }
 0x111   : > { %815 = shalt.err (!%p812_p2)
}
 0x112   : > { %s816_s28 = scalar_lea.hbm %s1127_s18, 256  ;;  %s820_s7 = scalar_lea.hbm %s1260_s2, 512 }
 0x113   : > { %p817_p6 = scmp.ne.s32.totalorder %s1127_s18, %s816_s28  ;;  %p821_p11 = scmp.lt.s32.totalorder %s1127_s18, %s1260_s2 }
 0x114   : > { %p822_p1 = scmp.lt.s32.totalorder %s820_s7, %s816_s28 }
 0x115   : > { %p818_p9 = pnand %p817_p6, %p1068_p0 }
 0x116   : > { %p823_p8 = por %p822_p1, %p821_p11 }
 0x117   : > { %p819_p13 = pneg %p818_p9 }
 0x119   : > { %p824_p4 = pnand %p823_p8, %p819_p13 }
 0x11b   : > { %827 = shalt.err (!%p824_p4)
}
 0x11c   : > { %s951_s9 = smov 128   ;;  %s952_s10 = smov 8   ;;  %379 = vrot.lane.b32.xlu1 %v658_v6, %s948_s5  ;;  %371 = vrot.lane.b32.xlu0 %v658_v6, %s949_s6 }
 0x11d   : > { %665 = dma.vmem_to_hbm [thread:$0]  (%p1068_p0), %s1129_s25, 256, %s1127_s18, %s386_s12, %s951_s9, %s951_s9, %s952_s10  }
 0x11e   : > { %s263_s14 = scalar_lea.vmem [#allocation8], %s1102_s1  ;;  %s390_s30 = sand.u32 1, %s1011_s21  }
 0x11f   : > { %s429_s28 = sshll.u32 %s263_s14, 4  ;;  %s270_s23 = scalar_lea.vmem [#allocation10], %s1102_s1  ;;  %s1165_s28 = int_to_ptr.vmem [resolvable:$true] %s429_s28 }
 0x120   : > { %s447_s7 = sshll.u32 %s270_s23, 4  ;;  %s1171_s5 = scalar_lea.hbm %s1261_s3, %s1117_s22  ;;  %s1173_s7 = int_to_ptr.vmem [resolvable:$true] %s447_s7 }
 0x121   : > { %s1179_s6 = scalar_lea.hbm %s1262_s4, %s1117_s22  ;;  %s1183_s18 = scalar_lea.sflag [#allocation9], %s390_s30 }
 0x122   : > { %s828_s12 = scalar_lea.vmem %s1165_s28, 256  ;;  %s953_s8 = smov [#allocation8]  }
 0x123   : > { %p829_p10 = scmp.ne.s32.totalorder %s1165_s28, %s828_s12  ;;  %s832_s27 = sshll.u32 %s953_s8, 4  ;;  %s833_s27 = int_to_ptr.vmem [resolvable:$false] %s832_s27 }
 0x124   : > { %s834_s13 = scalar_lea.vmem %s833_s27, 512  ;;  %p835_p5 = scmp.lt.s32.totalorder %s1165_s28, %s833_s27 }
 0x125   : > { %p830_p12 = pnand %p829_p10, %p1068_p0  ;;  %p836_p7 = scmp.lt.s32.totalorder %s834_s13, %s828_s12 }
 0x127   : > { %p831_p3 = pneg %p830_p12  ;;  %p837_p2 = por %p836_p7, %p835_p5 }
 0x129   : > { %p838_p6 = pnand %p837_p2, %p831_p3 }
 0x180   : > { %v378_v10 = vpop.permute.xlu1 %377  ;;  %v370_v11 = vpop.permute.xlu0 %369 }
 0x181   : > { %383 = vst.msk [vmem:[%s270_s23] sm:$0xff] %vm281_vm0, %v378_v10  ;;  %375 = vst.msk [vmem:[%s263_s14] sm:$0xff] %vm281_vm0, %v370_v11 }
 0x18e   : > { %v380_v12 = vpop.permute.xlu1 %379  ;;  %v372_v13 = vpop.permute.xlu0 %371 }
 0x18f   : > { %384 = vst.msk [vmem:[%s270_s23 + $0x8] sm:$0xff] %vm281_vm0, %v380_v12  ;;  %376 = vst.msk [vmem:[%s263_s14 + $0x8] sm:$0xff] %vm281_vm0, %v372_v13 }
 0x190   : > { %841 = shalt.err (!%p838_p6)
}
 0x191   : > { %s842_s22 = scalar_lea.hbm %s1171_s5, 256  ;;  %s846_s23 = scalar_lea.hbm %s1261_s3, 512 }
 0x192   : > { %p843_p9 = scmp.ne.s32.totalorder %s1171_s5, %s842_s22  ;;  %p847_p1 = scmp.lt.s32.totalorder %s1171_s5, %s1261_s3 }
 0x193   : > { %p848_p8 = scmp.lt.s32.totalorder %s846_s23, %s842_s22 }
 0x194   : > { %p844_p13 = pnand %p843_p9, %p1068_p0 }
 0x195   : > { %p849_p4 = por %p848_p8, %p847_p1 }
 0x196   : > { %p845_p11 = pneg %p844_p13 }
 0x198   : > { %p850_p10 = pnand %p849_p4, %p845_p11 }
 0x19a   : > { %853 = shalt.err (!%p850_p10)
}
 0x19b   : > { %666 = dma.vmem_to_hbm [thread:$0]  (%p1068_p0), %s1165_s28, 256, %s1171_s5, %s1183_s18, %s951_s9, %s951_s9, %s952_s10  }
 0x19c   : > { %s854_s1 = scalar_lea.vmem %s1173_s7, 256  ;;  %s954_s12 = smov [#allocation10]  }
 0x19d   : > { %p855_p12 = scmp.ne.s32.totalorder %s1173_s7, %s854_s1  ;;  %s858_s8 = sshll.u32 %s954_s12, 4  ;;  %s859_s8 = int_to_ptr.vmem [resolvable:$false] %s858_s8 }
 0x19e   : > { %s860_s27 = scalar_lea.vmem %s859_s8, 512  ;;  %p861_p7 = scmp.lt.s32.totalorder %s1173_s7, %s859_s8 }
 0x19f   : > { %p856_p3 = pnand %p855_p12, %p1068_p0  ;;  %p862_p2 = scmp.lt.s32.totalorder %s860_s27, %s854_s1 }
 0x1a1   : > { %p857_p5 = pneg %p856_p3  ;;  %p863_p6 = por %p862_p2, %p861_p7 }
 0x1a3   : > { %p864_p9 = pnand %p863_p6, %p857_p5 }
 0x1a5   : > { %867 = shalt.err (!%p864_p9)
}
 0x1a6   : > { %s868_s13 = scalar_lea.hbm %s1179_s6, 256  ;;  %s872_s22 = scalar_lea.hbm %s1262_s4, 512 }
 0x1a7   : > { %p869_p13 = scmp.ne.s32.totalorder %s1179_s6, %s868_s13  ;;  %p873_p8 = scmp.lt.s32.totalorder %s1179_s6, %s1262_s4 }
 0x1a8   : > { %p874_p4 = scmp.lt.s32.totalorder %s872_s22, %s868_s13 }
 0x1a9   : > { %p870_p11 = pnand %p869_p13, %p1068_p0 }
 0x1aa   : > { %p875_p10 = por %p874_p4, %p873_p8 }
 0x1ab   : > { %p871_p1 = pneg %p870_p11 }
 0x1ad   : > { %p876_p12 = pnand %p875_p10, %p871_p1 }
 0x1af   : > { %879 = shalt.err (!%p876_p12)
}
 0x1b0   : > { %667 = dma.vmem_to_hbm [thread:$0]  (%p1068_p0), %s1173_s7, 256, %s1179_s6, %s1183_s18, %s951_s9, %s951_s9, %s952_s10  }
 0x1b1 PF: > { %s462_s23 = sand.u32 1, %s922_s15   ;;  %p1281_p3 = scmp.ne.s32.totalorder %s1269_s24, 0 }
 0x1b2   : > { %p1282_p5 = scmp.ge.s32.totalorder %s942_s20, 2  ;;  %s463_s25 = scalar_lea.sflag [#allocation4], %s462_s23 }
 0x1b4   : > { %p680_p7 = pnand %p1282_p5, %p1281_p3 }
 0x1b6   : > { %p681_p2 = pneg %p680_p7 }
 0x1b8   : > { %913 = dma.done.wait (%p681_p2), %s463_s25, 256  }
 0x1b9   : > { %915 = vsyncadd (%p681_p2), %s463_s25, 4294967040  ;;  %s1283_s11 = sadd.s32 4294967294, %s942_s20  }
 0x1ba   : > { %s471_s21 = sand.u32 1, %s1283_s11  }
 0x1bb   : > { %s472_s1 = scalar_lea.sflag [#allocation9], %s471_s21 }
 0x1bc   : > { %917 = dma.done.wait (%p681_p2), %s472_s1, 512  }
 0x1bd   : > { %919 = vsyncadd (%p681_p2), %s472_s1, 4294966784  ;;  %s25_s20 = sadd.s32 1, %s942_s20   ;;  %s1284_s15 = smov %s926_s16 }
 0x1be   : > { %p22_p0 = scmp.ge.s32.totalorder %s25_s20, 4   ;;  %s1285_s16 = smov %s930_s17 }
 0x1bf   : > { %s1286_s17 = smov %s1077_s26  ;;  %s1287_s18 = smov %s938_s19 }
 0x1c0   : > { %s1288_s19 = smov %s1290_s29  ;;  %24 = sbr.rel (!%p22_p0) target bundleno = 11 (0xb), region = 109 }
 0x1c5   :  { %486 = vsyncpa [#allocation3], 1 }
 0x1c6   :  { %488 = vsyncpa [#allocation3 + $0x1], 1 }
 0x1c7   :  { %489 = vsyncpa [#allocation6], 1 }
 0x1c8   :  { %490 = vsyncpa [#allocation4], 1 }
 0x1c9   :  { %492 = vsyncpa [#allocation4 + $0x1], 1 }
 0x1ca   :  { %493 = vsyncpa [#allocation9], 1 }
 0x1cb   :  { %495 = vsyncpa [#allocation9 + $0x1], 1 }

</bundles_post_ra>
